<compile_context>
chip_gen: v6e
topology: v6e:2x2x1
jax: 0.10.0
libtpu: 0.0.40
codegen_flags: <defaults>
</compile_context>

<pallas_src>
import functools
import math

import jax
import jax.numpy as jnp
from jax.experimental import pallas as pl
from jax.experimental.pallas import tpu as pltpu


# --------------------------- hardware-derived knobs ---------------------------
def _vmem_capacity_bytes():
    try:
        return int(pltpu.get_tpu_info().vmem_capacity_bytes)
    except Exception:
        return 64 << 20          # conservative fallback = v7x per-core VMEM


_VMEM_BYTES = _vmem_capacity_bytes()
_BIG_VMEM = _VMEM_BYTES >= (96 << 20)            # v5e/v6e (128 MiB) vs v7x (64 MiB)
_VMEM_LIMIT = min(_VMEM_BYTES * 3 // 4, 100 << 20)   # explicit scoped-VMEM limit
_MM_ROW_CAP = 512 if _BIG_VMEM else 256          # matmul sublane-tile cap
_MM_LANE_CAP = 1024 if _BIG_VMEM else 512        # matmul lane-tile cap
_ROW_UNIT = 16                                   # legal sublane multiple for f32 AND bf16


# ----------------------------- tile-size helpers ------------------------------
def _pick_tile(dim, cap, unit):
    """Largest multiple of `unit` that divides `dim` and is <= cap, else `dim`."""
    if dim <= unit:
        return dim
    t = min(cap, dim)
    t -= t % unit
    while t >= unit:
        if dim % t == 0:
            return t
        t -= unit
    return dim


def _row_tile(m, cap=None):
    cap = _MM_ROW_CAP if cap is None else cap
    if m >= 2 * _ROW_UNIT:       # prefer >=2 row tiles: megacore + DMA/compute overlap
        cap = min(cap, max(_ROW_UNIT, m // 2))
    return _pick_tile(m, cap, _ROW_UNIT)


def _lane_tile(n, cap=None):
    """Lane tile: prefer 256-multiples (v6e/v7x MXU width), else 128-multiples,
    else the full dim (for dims < 128)."""
    cap = _MM_LANE_CAP if cap is None else cap
    if n % 256 == 0:
        t = _pick_tile(n, cap, 256)
        if t % 256 == 0:
            return t
    return _pick_tile(n, cap, 128)


def _const_spec(block_shape, index_map):
    """Constant-index weight spec: single-buffered (pl.Buffered(1)) so resident
    weights don't pay 2x VMEM; falls back if pipeline_mode is unavailable."""
    try:
        return pl.BlockSpec(block_shape, index_map, pipeline_mode=pl.Buffered(1))
    except TypeError:  # older Pallas without pipeline_mode
        return pl.BlockSpec(block_shape, index_map)


# ----------------------- in-kernel elementwise helpers -------------------------
_GELU_C = 0.7978845608028654     # sqrt(2/pi)


def _gelu_tanh(x):
    # tanh-approx GELU: tanh runs on the EUP slot (idle in the FFN kernel).
    # Documented small divergence (<~1e-3 abs) from PyTorch's exact-erf nn.GELU().
    return 0.5 * x * (1.0 + jnp.tanh(_GELU_C * (x + 0.044715 * x * x * x)))


# ------------------------ kernel 1: tiled matmul + bias ------------------------
def _matmul_bias_kernel(x_ref, w_ref, b_ref, o_ref, acc_ref):
    @pl.when(pl.program_id(2) == 0)
    def _init():
        acc_ref[...] = jnp.zeros_like(acc_ref)

    acc_ref[...] += jnp.dot(x_ref[...], w_ref[...],
                            preferred_element_type=jnp.float32)

    @pl.when(pl.program_id(2) == pl.num_programs(2) - 1)
    def _done():
        o_ref[...] = (acc_ref[...] + b_ref[...]).astype(o_ref.dtype)


def matmul_bias(x, w, b2d, *, out_dtype):
    """(M, K) @ (K, N) + b, tiled over (M, N, K) with an f32 VMEM accumulator.
    Operands arrive pre-cast (bf16 by default) so the MXU runs at its bf16 rate
    and operand DMA bytes are halved; accumulation stays f32."""
    M, K = x.shape
    K2, N = w.shape
    assert K == K2
    tm, tn, tk = _row_tile(M), _lane_tile(N), _lane_tile(K)
    grid = (M // tm, N // tn, K // tk)
    return pl.pallas_call(
        _matmul_bias_kernel,
        out_shape=jax.ShapeDtypeStruct((M, N), out_dtype),
        grid_spec=pltpu.PrefetchScalarGridSpec(
            num_scalar_prefetch=0,
            grid=grid,
            in_specs=[
                pl.BlockSpec((tm, tk), lambda i, j, k: (i, k)),
                pl.BlockSpec((tk, tn), lambda i, j, k: (k, j)),
                pl.BlockSpec((1, tn), lambda i, j, k: (0, j)),
            ],
            out_specs=pl.BlockSpec((tm, tn), lambda i, j, k: (i, j)),
            scratch_shapes=[pltpu.VMEM((tm, tn), jnp.float32)],
        ),
        compiler_params=pltpu.CompilerParams(
            dimension_semantics=("parallel", "parallel", "arbitrary"),
            vmem_limit_bytes=_VMEM_LIMIT),
    )(x, w, b2d)


# --------- kernel 2: fused QKV-proj + MHA + out-proj + residual + LN1 ----------
def _attn_ln_kernel(h_ref, bias_ref, wqkv_ref, bqkv_ref, wo_ref, bo_ref,
                    lnw_ref, lnb_ref, o_ref, *, nhead, scale, eps, cdtype):
    S, D = h_ref.shape[1], h_ref.shape[2]
    dh = D // nhead
    h = h_ref[0]                                            # (S, D), compute dtype
    # One lane-dense (S,D)@(D,3D) QKV projection: full MXU width, no per-head dots.
    qkv = jnp.dot(h, wqkv_ref[...],
                  preferred_element_type=jnp.float32) + bqkv_ref[...]

    # Split heads (S, D) -> (H, S, dh).
    # TODO(synk): for production S / dh, switch to flash-style (B, S/tq) q-tiling
    # with streamed K/V + online softmax instead of full (S, S) scores in VMEM.
    def heads(t):
        return t.reshape(S, nhead, dh).transpose(1, 0, 2).astype(cdtype)

    q = heads(qkv[:, :D])
    k = heads(qkv[:, D:2 * D])
    v = heads(qkv[:, 2 * D:])

    # Head-batched scores; contraction folded into the MXU feed (no explicit k.T).
    s = jnp.einsum("hqd,hkd->hqk", q, k,
                   preferred_element_type=jnp.float32) * scale
    s = s + bias_ref[0]                                     # (1, S) key-padding bias
    m = jnp.max(s, axis=-1, keepdims=True)
    e = jnp.exp(s - m)
    # approx reciprocal -> EUP slot; leaves probs ~1e-3-un-normalized (documented).
    p = e * pl.reciprocal(jnp.sum(e, axis=-1, keepdims=True), approx=True)
    ctx = jnp.einsum("hqk,hkd->hqd", p.astype(cdtype), v,
                     preferred_element_type=jnp.float32)    # (H, S, dh)
    ctx = ctx.transpose(1, 0, 2).reshape(S, D)              # concat heads -> (S, D)
    attn = jnp.dot(ctx.astype(cdtype), wo_ref[...],
                   preferred_element_type=jnp.float32) + bo_ref[...]

    z = h.astype(jnp.float32) + attn                        # residual (dropout = id)
    mean = jnp.mean(z, axis=-1, keepdims=True)
    cz = z - mean
    var = jnp.mean(cz * cz, axis=-1, keepdims=True)
    o_ref[0] = (cz * jax.lax.rsqrt(var + eps) * lnw_ref[...]
                + lnb_ref[...]).astype(o_ref.dtype)


def attention_ln_block(h, key_bias, wqkv, bqkv, wo, bo, ln_w, ln_b, *,
                       nhead, scale, out_dtype, eps=1e-5):
    B, S, D = h.shape
    return pl.pallas_call(
        functools.partial(_attn_ln_kernel, nhead=nhead, scale=scale, eps=eps,
                          cdtype=h.dtype),
        out_shape=jax.ShapeDtypeStruct((B, S, D), out_dtype),
        grid=(B,),
        in_specs=[
            pl.BlockSpec((1, S, D), lambda b: (b, 0, 0)),            # h
            pl.BlockSpec((1, 1, S), lambda b: (b, 0, 0)),            # key-pad bias
            _const_spec((D, 3 * D), lambda b: (0, 0)),               # W_qkv (lane-dense)
            _const_spec((1, 3 * D), lambda b: (0, 0)),               # b_qkv
            _const_spec((D, D), lambda b: (0, 0)),                   # W_o  (lane-dense)
            _const_spec((1, D), lambda b: (0, 0)),                   # b_o
            _const_spec((1, D), lambda b: (0, 0)),                   # ln1 w
            _const_spec((1, D), lambda b: (0, 0)),                   # ln1 b
        ],
        out_specs=pl.BlockSpec((1, S, D), lambda b: (b, 0, 0)),
        compiler_params=pltpu.CompilerParams(
            dimension_semantics=("parallel",),
            vmem_limit_bytes=_VMEM_LIMIT),
    )(h, key_bias, wqkv, bqkv, wo, bo, ln_w, ln_b)


# ------------- kernel 3: fused FF1 + GELU + FF2 + residual + LN2 ---------------
def _ffn_ln_kernel(h_ref, w1_ref, b1_ref, w2_ref, b2_ref, lnw_ref, lnb_ref,
                   o_ref, *, eps, cdtype):
    h = h_ref[...]                                                   # (tm, D)
    a = jnp.dot(h, w1_ref[...], preferred_element_type=jnp.float32) + b1_ref[...]
    a = _gelu_tanh(a)                                                # EUP tanh
    ff = jnp.dot(a.astype(cdtype), w2_ref[...],
                 preferred_element_type=jnp.float32) + b2_ref[...]
    z = h.astype(jnp.float32) + ff                                   # residual
    mean = jnp.mean(z, axis=-1, keepdims=True)
    cz = z - mean
    var = jnp.mean(cz * cz, axis=-1, keepdims=True)
    o_ref[...] = (cz * jax.lax.rsqrt(var + eps) * lnw_ref[...]
                  + lnb_ref[...]).astype(o_ref.dtype)


def ffn_ln_block(h2d, w1, b1, w2, b2, ln_w, ln_b, *, out_dtype, eps=1e-5):
    M, D = h2d.shape
    F = w1.shape[1]
    tm = _row_tile(M)
    # Weights use constant index_maps (DMA'd once, single-buffered).
    # TODO(synk): for production dim_feedforward, stream F-tiles of W1/W2 with an
    # extra grid axis + VMEM accumulator instead of keeping both fully resident.
    return pl.pallas_call(
        functools.partial(_ffn_ln_kernel, eps=eps, cdtype=h2d.dtype),
        out_shape=jax.ShapeDtypeStruct((M, D), out_dtype),
        grid=(M // tm,),
        in_specs=[
            pl.BlockSpec((tm, D), lambda i: (i, 0)),
            _const_spec((D, F), lambda i: (0, 0)),
            _const_spec((1, F), lambda i: (0, 0)),
            _const_spec((F, D), lambda i: (0, 0)),
            _const_spec((1, D), lambda i: (0, 0)),
            _const_spec((1, D), lambda i: (0, 0)),
            _const_spec((1, D), lambda i: (0, 0)),
        ],
        out_specs=pl.BlockSpec((tm, D), lambda i: (i, 0)),
        compiler_params=pltpu.CompilerParams(
            dimension_semantics=("parallel",),
            vmem_limit_bytes=_VMEM_LIMIT),
    )(h2d, w1, b1, w2, b2, ln_w, ln_b)


# --------------------------- parameters & forward ------------------------------
def init_params(key, in_dim, d_model, nhead, dff, num_layers, max_len):
    n_keys = 3 + 4 * num_layers
    keys = iter(jax.random.split(key, n_keys))

    def w(shape):
        return 0.02 * jax.random.normal(next(keys), shape, dtype=jnp.float32)

    params = {
        # nn.Linear(in_dim, d_model): stored as (in, out) so kernels do x @ W.
        "w_in": w((in_dim, d_model)),
        "b_in": jnp.zeros((d_model,), jnp.float32),
        # Created in the PyTorch __init__ but never used in forward().
        "in_pos_emb": w((max_len, d_model)),
        "out_pos_emb": w((max_len, d_model)),
        "layers": [],
    }
    for _ in range(num_layers):
        params["layers"].append({
            "w_qkv": w((d_model, 3 * d_model)),   # in_proj_weight.T (lane-dense)
            "b_qkv": jnp.zeros((3 * d_model,), jnp.float32),
            "w_o": w((d_model, d_model)),         # out_proj.weight.T
            "b_o": jnp.zeros((d_model,), jnp.float32),
            "w1": w((d_model, dff)),              # linear1.weight.T
            "b1": jnp.zeros((dff,), jnp.float32),
            "w2": w((dff, d_model)),              # linear2.weight.T
            "b2": jnp.zeros((d_model,), jnp.float32),
            "ln1_w": jnp.ones((d_model,), jnp.float32),
            "ln1_b": jnp.zeros((d_model,), jnp.float32),
            "ln2_w": jnp.ones((d_model,), jnp.float32),
            "ln2_b": jnp.zeros((d_model,), jnp.float32),
        })
    return params


def prepare_params(params, compute_dtype=jnp.bfloat16):
    """One-time precompute hoisted out of the forward loop: cast MXU weight
    operands to the compute dtype (bf16 by default) and reshape biases/LN params
    to lane-dense (1, N) rows.  Accumulation stays f32 inside the kernels."""
    cd = compute_dtype

    def row(v):
        return v.reshape(1, -1).astype(jnp.float32)

    prepped = {"w_in": params["w_in"].astype(cd), "b_in": row(params["b_in"]),
               "layers": []}
    for lyr in params["layers"]:
        prepped["layers"].append({
            "w_qkv": lyr["w_qkv"].astype(cd), "b_qkv": row(lyr["b_qkv"]),
            "w_o": lyr["w_o"].astype(cd), "b_o": row(lyr["b_o"]),
            "w1": lyr["w1"].astype(cd), "b1": row(lyr["b1"]),
            "w2": lyr["w2"].astype(cd), "b2": row(lyr["b2"]),
            "ln1_w": row(lyr["ln1_w"]), "ln1_b": row(lyr["ln1_b"]),
            "ln2_w": row(lyr["ln2_w"]), "ln2_b": row(lyr["ln2_b"]),
        })
    return prepped


def transformer_encoder_forward(prepped, x, pad_mask, *, nhead):
    """x: (B, S, in_dim) f32; pad_mask: (B, S) bool, True = padded key.
    Mirrors the PyTorch forward (eval mode: dropout = identity; pos-embeddings
    exist but are never applied)."""
    B, S, _ = x.shape
    D = prepped["w_in"].shape[1]
    assert D % nhead == 0
    scale = 1.0 / math.sqrt(D // nhead)
    cd = prepped["w_in"].dtype

    # Input Linear on the flattened (B*S, in_dim) slab (tiled matmul kernel).
    h = matmul_bias(x.reshape(B * S, -1).astype(cd), prepped["w_in"],
                    prepped["b_in"], out_dtype=cd).reshape(B, S, D)

    # Additive key-padding bias, built once.  (-1e9 matches PyTorch when a row
    # has >=1 valid key; a fully padded row gives a uniform softmax instead of
    # PyTorch's NaN -- documented divergence.)
    key_bias = jnp.where(pad_mask, -1e9, 0.0).astype(jnp.float32).reshape(B, 1, S)

    for lyr in prepped["layers"]:
        # Fused: QKV proj + MHA + out-proj + residual + LayerNorm1.
        h = attention_ln_block(h, key_bias, lyr["w_qkv"], lyr["b_qkv"],
                               lyr["w_o"], lyr["b_o"], lyr["ln1_w"], lyr["ln1_b"],
                               nhead=nhead, scale=scale, out_dtype=cd)
        # Fused: FF1 + GELU + FF2 + residual + LayerNorm2.
        # TODO(synk): on v5e/v6e (128 MiB VMEM) fuse this with the attention
        # kernel so h never round-trips HBM inside a layer.
        h = ffn_ln_block(h.reshape(B * S, D), lyr["w1"], lyr["b1"], lyr["w2"],
                         lyr["b2"], lyr["ln2_w"], lyr["ln2_b"],
                         out_dtype=cd).reshape(B, S, D)

    return h.astype(jnp.float32)


# ------------------------ pure-jnp reference (sanity) --------------------------
def _layernorm_ref(z, w, b, eps=1e-5):
    m = z.mean(-1, keepdims=True)
    c = z - m
    v = (c * c).mean(-1, keepdims=True)
    return c * jax.lax.rsqrt(v + eps) * w + b


def _reference_forward(params, x, pad_mask, *, nhead):
    B, S, _ = x.shape
    D = params["w_in"].shape[1]
    dh = D // nhead
    h = x @ params["w_in"] + params["b_in"]
    bias = jnp.where(pad_mask, -1e9, 0.0)[:, None, None, :]
    for lyr in params["layers"]:
        qkv = h @ lyr["w_qkv"] + lyr["b_qkv"]
        q, k, v = jnp.split(qkv, 3, axis=-1)
        sp = lambda t: t.reshape(B, S, nhead, dh).transpose(0, 2, 1, 3)
        q, k, v = sp(q), sp(k), sp(v)
        s = jnp.einsum("bhqd,bhkd->bhqk", q, k) / math.sqrt(dh) + bias
        p = jax.nn.softmax(s, axis=-1)
        ctx = jnp.einsum("bhqk,bhkd->bhqd", p, v).transpose(0, 2, 1, 3).reshape(B, S, D)
        h = _layernorm_ref(h + ctx @ lyr["w_o"] + lyr["b_o"],
                           lyr["ln1_w"], lyr["ln1_b"])
        ff = (jax.nn.gelu(h @ lyr["w1"] + lyr["b1"], approximate=False)
              @ lyr["w2"] + lyr["b2"])
        h = _layernorm_ref(h + ff, lyr["ln2_w"], lyr["ln2_b"])
    return h


# ------------------------------------ main --------------------------------------
if __name__ == "__main__":
    # module args: in_dim=16, d_model=32, nhead=4, dim_feedforward=64,
    #              num_layers=2, dropout=0.0 (eval), max_len=16
    B, S = 2, 8
    in_dim, d_model, nhead = 16, 32, 4
    dim_feedforward, num_layers, max_len = 64, 2, 16

    key = jax.random.PRNGKey(0)
    k_params, k_x = jax.random.split(key)
    params = init_params(k_params, in_dim, d_model, nhead,
                         dim_feedforward, num_layers, max_len)
    x = jax.random.normal(k_x, (B, S, in_dim), dtype=jnp.float32)
    pad_mask = jnp.zeros((B, S), dtype=bool).at[1, 6:].set(True)  # pad last 2 keys of batch 1

    ref = _reference_forward(params, x, pad_mask, nhead=nhead)

    # Default fast path: bf16 MXU operands + bf16 inter-kernel activations
    # (f32 accumulation, f32 softmax/LayerNorm statistics).
    out = transformer_encoder_forward(prepare_params(params, jnp.bfloat16),
                                      x, pad_mask, nhead=nhead)
    out = jax.block_until_ready(out)
    assert out.shape == (B, S, d_model)
    assert bool(jnp.all(jnp.isfinite(out)))
    err_bf16 = float(jnp.max(jnp.abs(out - ref)))
    assert err_bf16 < 7.5e-2, f"bf16 path mismatch vs reference: {err_bf16}"

    # Parity path (flag per review): same kernels with f32 operands.
    out32 = transformer_encoder_forward(prepare_params(params, jnp.float32),
                                        x, pad_mask, nhead=nhead)
    out32 = jax.block_until_ready(out32)
    err_f32 = float(jnp.max(jnp.abs(out32 - ref)))
    assert err_f32 < 2e-2, f"f32 path mismatch vs reference: {err_f32}"

    print("KERNEL_OK")
</pallas_src>

<mosaic_0001>
module attributes {stable_mosaic.version = 11 : i64} {
  func.func @_matmul_bias_kernel(%arg0: i32, %arg1: i32, %arg2: i32, %arg3: memref<16x16xbf16, #tpu.memory_space<vmem>>, %arg4: memref<16x32xbf16, #tpu.memory_space<vmem>>, %arg5: memref<1x32xf32, #tpu.memory_space<vmem>>, %arg6: memref<16x32xbf16, #tpu.memory_space<vmem>>, %arg7: memref<16x32xf32, #tpu.memory_space<vmem>>) attributes {dimension_semantics = [#tpu.dimension_semantics<parallel>, #tpu.dimension_semantics<parallel>, #tpu.dimension_semantics<arbitrary>], iteration_bounds = array<i64: 1, 1, 1>, scalar_prefetch = 0 : i64, scratch_operands = 1 : i64, tpu.core_type = #tpu.core_type<tc>, window_params = [{transform_indices = @transform_0, window_bounds = array<i64: 16, 16>}, {transform_indices = @transform_1, window_bounds = array<i64: 16, 32>}, {transform_indices = @transform_2, window_bounds = array<i64: 1, 32>}, {transform_indices = @transform_3, window_bounds = array<i64: 16, 32>}]} {
    %c0_i32 = arith.constant 0 : i32
    %0 = arith.cmpi eq, %arg2, %c0_i32 : i32
    %1 = arith.extui %0 : i1 to i32
    %c0_i32_0 = arith.constant 0 : i32
    %2 = arith.cmpi ne, %1, %c0_i32_0 : i32
    scf.if %2 {
      %cst_10 = arith.constant 0.000000e+00 : f32
      %12 = vector.broadcast %cst_10 : f32 to vector<16x32xf32>
      %c0_11 = arith.constant 0 : index
      %c0_12 = arith.constant 0 : index
      %13 = vector.load %arg7[%c0_11, %c0_12] : memref<16x32xf32, #tpu.memory_space<vmem>>, vector<16x32xf32>
      tpu.vector_store %arg7[%c0_11, %c0_12], %12 {strides = array<i32>} : memref<16x32xf32, #tpu.memory_space<vmem>>, vector<16x32xf32>,
    } else {
    }
    %c0 = arith.constant 0 : index
    %c0_1 = arith.constant 0 : index
    %3 = vector.load %arg7[%c0, %c0_1] : memref<16x32xf32, #tpu.memory_space<vmem>>, vector<16x32xf32>
    %c0_2 = arith.constant 0 : index
    %c0_3 = arith.constant 0 : index
    %4 = vector.load %arg3[%c0_2, %c0_3] : memref<16x16xbf16, #tpu.memory_space<vmem>>, vector<16x16xbf16>
    %c0_4 = arith.constant 0 : index
    %c0_5 = arith.constant 0 : index
    %5 = vector.load %arg4[%c0_4, %c0_5] : memref<16x32xbf16, #tpu.memory_space<vmem>>, vector<16x32xbf16>
    %cst = arith.constant dense<0.000000e+00> : vector<16x32xf32>
    %6 = tpu.matmul %4, %5, %cst {dimension_numbers = #tpu.dot_dimension_numbers<[1], [0], [0], [1], [0, 0, 1, 1], [], []>} : vector<16x16xbf16>, vector<16x32xbf16>, vector<16x32xf32> -> vector<16x32xf32>
    %7 = arith.addf %3, %6 : vector<16x32xf32>
    %c0_6 = arith.constant 0 : index
    %c0_7 = arith.constant 0 : index
    %8 = vector.load %arg7[%c0_6, %c0_7] : memref<16x32xf32, #tpu.memory_space<vmem>>, vector<16x32xf32>
    tpu.vector_store %arg7[%c0_6, %c0_7], %7 {strides = array<i32>} : memref<16x32xf32, #tpu.memory_space<vmem>>, vector<16x32xf32>,
    %c0_i32_8 = arith.constant 0 : i32
    %9 = arith.cmpi eq, %arg2, %c0_i32_8 : i32
    %10 = arith.extui %9 : i1 to i32
    %c0_i32_9 = arith.constant 0 : i32
    %11 = arith.cmpi ne, %10, %c0_i32_9 : i32
    scf.if %11 {
      %c0_10 = arith.constant 0 : index
      %c0_11 = arith.constant 0 : index
      %12 = vector.load %arg7[%c0_10, %c0_11] : memref<16x32xf32, #tpu.memory_space<vmem>>, vector<16x32xf32>
      %c0_12 = arith.constant 0 : index
      %c0_13 = arith.constant 0 : index
      %13 = vector.load %arg5[%c0_12, %c0_13] : memref<1x32xf32, #tpu.memory_space<vmem>>, vector<1x32xf32>
      %14 = vector.broadcast %13 : vector<1x32xf32> to vector<16x32xf32>
      %15 = arith.addf %12, %14 : vector<16x32xf32>
      %16 = arith.truncf %15 : vector<16x32xf32> to vector<16x32xbf16>
      %c0_14 = arith.constant 0 : index
      %c0_15 = arith.constant 0 : index
      %17 = vector.load %arg6[%c0_14, %c0_15] : memref<16x32xbf16, #tpu.memory_space<vmem>>, vector<16x32xbf16>
      tpu.vector_store %arg6[%c0_14, %c0_15], %16 {strides = array<i32>} : memref<16x32xbf16, #tpu.memory_space<vmem>>, vector<16x32xbf16>,
    } else {
    }
    return
  }
  func.func @transform_0(%arg0: i32, %arg1: i32, %arg2: i32) -> (i32, i32) {
    %c0_i32 = arith.constant 0 : i32
    return %arg0, %arg2 : i32, i32
  }
  func.func @transform_1(%arg0: i32, %arg1: i32, %arg2: i32) -> (i32, i32) {
    %c0_i32 = arith.constant 0 : i32
    return %arg2, %arg1 : i32, i32
  }
  func.func @transform_2(%arg0: i32, %arg1: i32, %arg2: i32) -> (i32, i32) {
    %c0_i32 = arith.constant 0 : i32
    %c0_i32_0 = arith.constant 0 : i32
    return %c0_i32, %arg1 : i32, i32
  }
  func.func @transform_3(%arg0: i32, %arg1: i32, %arg2: i32) -> (i32, i32) {
    %c0_i32 = arith.constant 0 : i32
    return %arg0, %arg1 : i32, i32
  }
}

</mosaic_0001>

<bundles_post_ra>
// kernel: tpu_custom_call.1
= control target key start
LH: loop header
LB: loop body
LE: loop exit
PB: predicated region body
PF: predicated region fallthrough
CT: control target
= control target key end

     0   :  { %8 = vsyncpa [#allocation4], 0  ;;  %s304_s0 = inlined_call_operand.hbm [shape: bf16[16,16], index: 0, kind: input, shape index: {}]   ;;  %s305_s1 = inlined_call_operand.hbm [shape: bf16[16,32], index: 1, kind: input, shape index: {}]   ;;  %s306_s2 = inlined_call_operand.vmem [shape: f32[1,32], index: 2, kind: input, shape index: {}]   ;;  %s307_s3 = inlined_call_operand.hbm [shape: bf16[16,32], index: 3, kind: output, shape index: {}]  }
   0x1   :  { %9 = vsyncpa [#allocation7], 0 }
   0x2   :  { %10 = vsyncpa [#allocation5], 0  ;;  %s252_s12 = smov [#allocation3]  }
   0x3   :  { %s16_s13 = sshll.u32 %s252_s12, 4  ;;  %s17_s13 = int_to_ptr.vmem [resolvable:$true] %s16_s13 }
   0x4   :  { %s194_s14 = scalar_lea.vmem %s17_s13, 128  ;;  %p199_p1 = scmp.lt.s32.totalorder %s17_s13, %s17_s13 }
   0x5   :  { %p195_p0 = scmp.ne.s32.totalorder %s17_s13, %s194_s14  ;;  %p200_p2 = scmp.lt.s32.totalorder %s194_s14, %s194_s14 }
   0x7   :  { %p201_p3 = por %p200_p2, %p199_p1 }
   0x9   :  { %p202_p4 = pnand %p201_p3, %p195_p0 }
   0xb   :  { %205 = shalt.err (!%p202_p4)
}
   0xc   :  { %s253_s15 = smov 64   ;;  %s254_s16 = smov 4  }
   0xd   :  { %22 = dma.hbm_to_vmem [thread:$0]  %s304_s0, 128, %s17_s13, [#allocation4], %s253_s15, %s253_s15, %s254_s16  }
   0xe   :  { %s255_s19 = smov [#allocation6]  }
   0xf   :  { %s28_s20 = sshll.u32 %s255_s19, 4  ;;  %s29_s20 = int_to_ptr.vmem [resolvable:$true] %s28_s20 }
  0x10   :  { %s214_s21 = scalar_lea.vmem %s29_s20, 128  ;;  %p219_p6 = scmp.lt.s32.totalorder %s29_s20, %s29_s20 }
  0x11   :  { %p215_p5 = scmp.ne.s32.totalorder %s29_s20, %s214_s21  ;;  %p220_p7 = scmp.lt.s32.totalorder %s214_s21, %s214_s21 }
  0x13   :  { %p221_p8 = por %p220_p7, %p219_p6 }
  0x15   :  { %p222_p9 = pnand %p221_p8, %p215_p5 }
  0x17   :  { %225 = shalt.err (!%p222_p9)
}
  0x18   :  { %34 = dma.hbm_to_vmem [thread:$0]  %s305_s1, 128, %s29_s20, [#allocation7], %s253_s15, %s253_s15, %s254_s16  }
  0x19   :  { %246 = dma.done.wait [#allocation4], 128  }
  0x1a   :  { %247 = vsyncadd [#allocation4], 4294967168 }
  0x1b   :  { %248 = dma.done.wait [#allocation7], 128  }
  0x1c   :  { %249 = vsyncadd [#allocation7], 4294967168  ;;  %vm48_vm0 = vcmask 261120   ;;  %v256_v0 = vmov 0.0   ;;  %vm257_vm1 = vmmov 0   ;;  %v184_v1 = vld [vmem:[#allocation6] sm:$0xff]  }
  0x1d   :  { %49 = vst.msk [vmem:[#allocation2] sm:$0xff] %vm48_vm0, %v256_v0  ;;  %50 = vst.msk [vmem:[#allocation2 + $0x8] sm:$0xff] %vm48_vm0, %v256_v0  ;;  %171 = vmatprep.subr.bf16.mxu0 %v256_v0  ;;  %173 = vmatprep.mubr.msk.bf16.mxu0 %vm257_vm1, %v256_v0  ;;  %v185_v2 = vld [vmem:[#allocation3] sm:$0xff]   ;;  %vm68_vm2 = vcmask 130048   ;;  %v164_v11 = vld [vmem:[%s306_s2] ss:$0 sm:$0xff] }
  0x1e   :  { %172 = vmatpush3.bf16.msra.mxu0 %v184_v1  ;;  %vm140_vm3 = vcmask 257024   ;;  %s258_s24 = smov [#allocation8]  }
  0x1f   :  { %s148_s25 = sshll.u32 %s258_s24, 4  ;;  %s149_s25 = int_to_ptr.vmem [resolvable:$true] %s148_s25 }
  0x20   :  { %s226_s26 = scalar_lea.vmem %s149_s25, 128  ;;  %p231_p11 = scmp.lt.s32.totalorder %s149_s25, %s149_s25 }
  0x21   :  { %174 = vmatmul.mubr.msk.bf16.vlgmr.msra.gmra.mxu0 %vm68_vm2, %v185_v2  ;;  %p227_p10 = scmp.ne.s32.totalorder %s149_s25, %s226_s26  ;;  %p232_p12 = scmp.lt.s32.totalorder %s226_s26, %s226_s26 }
  0x23   :  { %p233_p13 = por %p232_p12, %p231_p11 }
  0x24   :  { %v51_v3 = vld [vmem:[#allocation2] sm:$0xff]  ;;  %v52_v7 = vld [vmem:[#allocation2 + $0x8] sm:$0xff] }
  0x25   :  { %p234_p0 = pnand %p233_p13, %p227_p10 }
  0xe1   :  { %v106_v4 = vpop.f32.mrf.mxu0 }
  0xe2   :  { %v113_v5 = vadd.f32 %v106_v4, %v51_v3 }
  0xe3   :  { %v175_v6 = vpop.f32.mrf.mxu0 }
  0xe4   :  { %116 = vst.msk [vmem:[#allocation2] sm:$0xff] %vm48_vm0, %v113_v5 }
  0xe5   :  { %v109_v8 = vpop.f32.mrf.mxu0 }
  0xe6   :  { %v114_v9 = vadd.f32 %v109_v8, %v52_v7 }
  0xe7   :  { %v176_v10 = vpop.f32.mrf.mxu0 }
  0xe8   :  { %117 = vst.msk [vmem:[#allocation2 + $0x8] sm:$0xff] %vm48_vm0, %v114_v9 }
  0xeb   :  { %v121_v12 = vld [vmem:[#allocation2] sm:$0xff] }
  0xec   :  { %v130_v13 = vadd.f32 %v164_v11, %v121_v12 }
  0xee   :  { %v167_v14 = vpack.c.bf16 %v130_v13, %v130_v13 }
  0xef   :  { %v122_v15 = vld [vmem:[#allocation2 + $0x8] sm:$0xff] }
  0xf0   :  { %v131_v16 = vadd.f32 %v164_v11, %v122_v15  ;;  %141 = vst.msk [vmem:[#allocation8] sm:$0xf] %vm140_vm3, %v167_v14 }
  0xf2   :  { %v168_v17 = vpack.c.bf16 %v131_v16, %v131_v16 }
  0xf4   :  { %142 = vst.msk [vmem:[#allocation8 + $0x4] sm:$0xf] %vm140_vm3, %v168_v17 }
  0xf5   :  { %237 = shalt.err (!%p234_p0)
}
  0xf6   :  { %154 = dma.vmem_to_hbm [thread:$0]  %s149_s25, 128, %s307_s3, [#allocation5], %s253_s15, %s253_s15, %s254_s16  }
  0xf7   :  { %250 = dma.done.wait [#allocation5], 128  }
  0xf8   :  { %251 = vsyncadd [#allocation5], 4294967168 }
  0xf9   :  { %158 = vsyncpa [#allocation4], 1 }
  0xfa   :  { %159 = vsyncpa [#allocation7], 1 }
  0xfb   :  { %160 = vsyncpa [#allocation5], 1 }

</bundles_post_ra>
